<compile_context>
chip_gen: v7x
topology: tpu7x:2x2x1
jax: 0.10.0
libtpu: 0.0.40
codegen_flags: <defaults>
</compile_context>

<pallas_src>
import functools
import math

import jax
import jax.numpy as jnp
import numpy as np
from jax.experimental import pallas as pl
from jax.experimental.pallas import tpu as pltpu


LANES = 128  # vreg lane width; hidden widths (+1 ones column) must fit in one lane tile


def _round_up(x, m):
    return (x + m - 1) // m * m


def make_offsets(state_dim, act_dim, fc1, fc2, fc3):
    """Row offsets of each layer inside the packed buffer (all multiples of 16)."""
    assert max(fc1, fc2, fc3) + 1 <= LANES, "hidden widths must be <= 127"
    sd_pad = _round_up(state_dim, 16)
    ad_pad = _round_up(act_dim, 16)
    off = {}
    off["w1s"] = 0                       # (state_dim, LANES)
    off["w1a"] = sd_pad                  # (act_dim,  LANES)
    off["b1"] = sd_pad + ad_pad          # (1, LANES)  bias row + ones-column generator
    off["w2"] = off["b1"] + 16           # (LANES, LANES) with b2 folded in
    off["w3"] = off["w2"] + LANES        # (LANES, LANES) with b3 folded in
    off["wq"] = off["w3"] + LANES        # (LANES, LANES) with bq folded in
    off["total"] = off["wq"] + LANES
    return off


def pack_params(torch_params, state_dim, act_dim, dtype=jnp.float32):
    """Pack 4 nn.Linear layers into one lane-padded (R, 128) buffer.

    torch_params = (w1, b1, w2, b2, w3, b3, wq, bq) in nn.Linear layout:
      w*: (out_features, in_features), b*: (out_features,)
    Layer-1 bias is kept as a row (added in-kernel); biases of layers 2..4 are folded
    into the weights via a ones column that lives at lane index `prev_layer_width`.
    """
    w1, b1, w2, b2, w3, b3, wq, bq = [np.asarray(p, np.float32) for p in torch_params]
    fc1, fc2, fc3 = w1.shape[0], w2.shape[0], w3.shape[0]
    off = make_offsets(state_dim, act_dim, fc1, fc2, fc3)
    buf = np.zeros((off["total"], LANES), np.float32)

    # layer 1: split W1 along the (concatenated) input axis; lane fc1 of h1 becomes 1.0
    buf[off["w1s"]:off["w1s"] + state_dim, :fc1] = w1[:, :state_dim].T
    buf[off["w1a"]:off["w1a"] + act_dim, :fc1] = w1[:, state_dim:].T
    buf[off["b1"], :fc1] = b1
    buf[off["b1"], fc1] = 1.0            # ones-column generator: h1[:, fc1] = relu(1) = 1
    # layer 2: bias folded into row fc1 (h1's ones column); propagate ones to lane fc2
    buf[off["w2"]:off["w2"] + fc1, :fc2] = w2.T
    buf[off["w2"] + fc1, :fc2] = b2
    buf[off["w2"] + fc1, fc2] = 1.0
    # layer 3
    buf[off["w3"]:off["w3"] + fc2, :fc3] = w3.T
    buf[off["w3"] + fc2, :fc3] = b3
    buf[off["w3"] + fc2, fc3] = 1.0
    # q head (output width 1; no ones column needed afterwards)
    buf[off["wq"]:off["wq"] + fc3, 0] = wq[0, :]
    buf[off["wq"] + fc3, 0] = bq[0]
    return jnp.asarray(buf, dtype)


def _critic_kernel(state_ref, action_ref, params_ref, q_ref, *,
                   state_dim, act_dim, off, out_w):
    """Fused 4-layer MLP on one (TB, *) batch tile; all weights sliced from one buffer."""
    dt = params_ref.dtype                      # f32 (or bf16 for the MXU-input path)
    s = state_ref[...].astype(dt)              # (TB, state_dim)
    a = action_ref[...].astype(dt)             # (TB, act_dim)

    w1s = params_ref[off["w1s"]:off["w1s"] + state_dim, :]
    w1a = params_ref[off["w1a"]:off["w1a"] + act_dim, :]
    b1 = params_ref[off["b1"]:off["b1"] + 1, :].astype(jnp.float32)
    w2 = params_ref[off["w2"]:off["w2"] + LANES, :]
    w3 = params_ref[off["w3"]:off["w3"] + LANES, :]
    wq = params_ref[off["wq"]:off["wq"] + LANES, :]

    # layer 1 — concat fused as two partial matmuls over the split K axis (f32 accumulate)
    h1 = jnp.dot(s, w1s, preferred_element_type=jnp.float32)
    h1 = h1 + jnp.dot(a, w1a, preferred_element_type=jnp.float32) + b1
    h1 = jnp.maximum(h1, 0.0)                  # (TB, 128); lane fc1 carries the ones column
    # layers 2..4 — bias carried by the ones column; elementwise math stays in f32
    h2 = jnp.maximum(jnp.dot(h1.astype(dt), w2, preferred_element_type=jnp.float32), 0.0)
    h3 = jnp.maximum(jnp.dot(h2.astype(dt), w3, preferred_element_type=jnp.float32), 0.0)
    q = jnp.maximum(jnp.dot(h3.astype(dt), wq, preferred_element_type=jnp.float32), 0.0)
    # lane 0 holds q; remaining lanes are 0.  out_w = LANES (lane-dense, small B) or 8
    # (narrow writeback once the kernel turns HBM-write-bound at training-sized B).
    q_ref[...] = q[:, :out_w].astype(q_ref.dtype)


def _choose_batch_tile(B, max_tile, min_tiles):
    """Smallest tile count >= min_tiles whose 8-aligned tile fits within max_tile."""
    n = max(min_tiles, math.ceil(B / max_tile))
    tb = _round_up(math.ceil(B / n), 8)
    return min(tb, _round_up(max_tile, 8))


def build_critic_forward(state_dim, act_dim, fc1, fc2, fc3, *, max_batch_tile=2048):
    """Returns a jitted forward(state, action, packed_params) -> (B, 1) q values."""
    off = make_offsets(state_dim, act_dim, fc1, fc2, fc3)

    def forward(state, action, packed_params):
        B = state.shape[0]
        # >= 2 tiles for large batches so the "parallel" axis shards across both v7x
        # TensorCores; the extra ~0.35 us step is noise on single-TC v5e/v6e chips.
        min_tiles = 2 if B >= 1024 else 1
        tb = _choose_batch_tile(B, max_batch_tile, min_tiles)
        grid = (pl.cdiv(B, tb),)                     # ragged last block handled by Pallas
        out_w = 8 if B >= 8192 else LANES            # narrow writeback at training batch

        kernel = functools.partial(_critic_kernel, state_dim=state_dim,
                                   act_dim=act_dim, off=off, out_w=out_w)
        q = pl.pallas_call(
            kernel,
            out_shape=jax.ShapeDtypeStruct((B, out_w), jnp.float32),
            grid=grid,
            in_specs=[
                pl.BlockSpec((tb, state_dim), lambda i: (i, 0)),
                pl.BlockSpec((tb, act_dim), lambda i: (i, 0)),
                # packed weights: constant block index -> stays resident in VMEM
                pl.BlockSpec((off["total"], LANES), lambda i: (0, 0)),
            ],
            out_specs=pl.BlockSpec((tb, out_w), lambda i: (i, 0)),
            compiler_params=pltpu.CompilerParams(
                dimension_semantics=("parallel",)),   # batch tiles shard across v7x TCs
        )(state, action, packed_params)
        return q[:, :1]

    return jax.jit(forward)


def init_params(key, d_in, fc1, fc2, fc3):
    """Synthetic nn.Linear-layout params: w (out, in) ~ kaiming_normal, b (out,) ~ U."""
    # TODO(synk): bit-exact reproduction of torch.manual_seed(42) kaiming_normal_ init is
    # not possible in JAX; synthetic params with the same distribution are used instead.
    dims = [(d_in, fc1), (fc1, fc2), (fc2, fc3), (fc3, 1)]
    params = []
    for fan_in, fan_out in dims:
        key, kw, kb = jax.random.split(key, 3)
        std = float(np.sqrt(2.0 / fan_in))
        w = jax.random.normal(kw, (fan_out, fan_in), jnp.float32) * std
        bound = float(1.0 / np.sqrt(fan_in))
        b = jax.random.uniform(kb, (fan_out,), jnp.float32, -bound, bound)
        params += [w, b]
    return tuple(params)


def reference_forward(state, action, torch_params):
    """Pure-JAX reference matching the PyTorch module exactly (incl. ReLU on q)."""
    w1, b1, w2, b2, w3, b3, wq, bq = torch_params
    x = jnp.concatenate([state, action], axis=1)
    x = jnp.maximum(x @ w1.T + b1, 0.0)
    x = jnp.maximum(x @ w2.T + b2, 0.0)
    x = jnp.maximum(x @ w3.T + b3, 0.0)
    return jnp.maximum(x @ wq.T + bq, 0.0)


if __name__ == "__main__":
    # Shapes consistent with the module:
    #   input_dims=24, n_agents=3, n_actions=4 -> D_in = 24 + 12 = 36
    #   fc1_dims=64, fc2_dims=64, fc3_dims=32, q -> 1
    batch, state_dim, n_agents, n_actions = 8, 24, 3, 4
    fc1_dims, fc2_dims, fc3_dims = 64, 64, 32
    act_dim = n_agents * n_actions
    d_in = state_dim + act_dim

    key = jax.random.PRNGKey(0)
    k_s, k_a, k_p = jax.random.split(key, 3)
    state = jax.random.normal(k_s, (batch, state_dim), jnp.float32)
    action = jax.random.uniform(k_a, (batch, act_dim), jnp.float32)
    torch_params = init_params(k_p, d_in, fc1_dims, fc2_dims, fc3_dims)

    # f32 packing for the strict correctness check; pass dtype=jnp.bfloat16 for the bf16
    # MXU path (f32 accumulation, f32 elementwise) once batches are training-sized.
    packed = pack_params(torch_params, state_dim, act_dim, dtype=jnp.float32)
    forward = build_critic_forward(state_dim, act_dim, fc1_dims, fc2_dims, fc3_dims)

    q = forward(state, action, packed)
    jax.block_until_ready(q)

    q_ref = reference_forward(state, action, torch_params)
    assert q.shape == (batch, 1)
    assert jnp.allclose(q, q_ref, atol=1e-4, rtol=1e-5), "mismatch vs reference"

    print("KERNEL_OK")
</pallas_src>

<mosaic_0001>
module attributes {stable_mosaic.version = 11 : i64} {
  func.func @_critic_kernel(%arg0: i32, %arg1: memref<8x24xf32, #tpu.memory_space<vmem>>, %arg2: memref<8x12xf32, #tpu.memory_space<vmem>>, %arg3: memref<448x128xf32, #tpu.memory_space<vmem>>, %arg4: memref<8x128xf32, #tpu.memory_space<vmem>>) attributes {dimension_semantics = [#tpu.dimension_semantics<parallel>], iteration_bounds = array<i64: 1>, scalar_prefetch = 0 : i64, scratch_operands = 0 : i64, tpu.core_type = #tpu.core_type<tc>, window_params = [{transform_indices = @transform_0, window_bounds = array<i64: 8, 24>}, {transform_indices = @transform_1, window_bounds = array<i64: 8, 12>}, {pipeline_mode = #tpu.pipeline_mode<synchronous>, transform_indices = @transform_2, window_bounds = array<i64: 448, 128>}, {transform_indices = @transform_3, window_bounds = array<i64: 8, 128>}]} {
    %c0 = arith.constant 0 : index
    %c0_0 = arith.constant 0 : index
    %0 = vector.load %arg1[%c0, %c0_0] : memref<8x24xf32, #tpu.memory_space<vmem>>, vector<8x24xf32>
    %c0_1 = arith.constant 0 : index
    %c0_2 = arith.constant 0 : index
    %1 = vector.load %arg2[%c0_1, %c0_2] : memref<8x12xf32, #tpu.memory_space<vmem>>, vector<8x12xf32>
    %c0_3 = arith.constant 0 : index
    %c0_4 = arith.constant 0 : index
    %2 = vector.load %arg3[%c0_3, %c0_4] : memref<448x128xf32, #tpu.memory_space<vmem>>, vector<24x128xf32>
    %c32 = arith.constant 32 : index
    %c0_5 = arith.constant 0 : index
    %3 = vector.load %arg3[%c32, %c0_5] : memref<448x128xf32, #tpu.memory_space<vmem>>, vector<12x128xf32>
    %c48 = arith.constant 48 : index
    %c0_6 = arith.constant 0 : index
    %4 = vector.load %arg3[%c48, %c0_6] : memref<448x128xf32, #tpu.memory_space<vmem>>, vector<1x128xf32>
    %c64 = arith.constant 64 : index
    %c0_7 = arith.constant 0 : index
    %5 = vector.load %arg3[%c64, %c0_7] : memref<448x128xf32, #tpu.memory_space<vmem>>, vector<128x128xf32>
    %c192 = arith.constant 192 : index
    %c0_8 = arith.constant 0 : index
    %6 = vector.load %arg3[%c192, %c0_8] : memref<448x128xf32, #tpu.memory_space<vmem>>, vector<128x128xf32>
    %c320 = arith.constant 320 : index
    %c0_9 = arith.constant 0 : index
    %7 = vector.load %arg3[%c320, %c0_9] : memref<448x128xf32, #tpu.memory_space<vmem>>, vector<128x128xf32>
    %cst = arith.constant dense<0.000000e+00> : vector<8x128xf32>
    %8 = tpu.matmul %0, %2, %cst {dimension_numbers = #tpu.dot_dimension_numbers<[1], [0], [0], [1], [0, 0, 1, 1], [], []>} : vector<8x24xf32>, vector<24x128xf32>, vector<8x128xf32> -> vector<8x128xf32>
    %cst_10 = arith.constant dense<0.000000e+00> : vector<8x128xf32>
    %9 = tpu.matmul %1, %3, %cst_10 {dimension_numbers = #tpu.dot_dimension_numbers<[1], [0], [0], [1], [0, 0, 1, 1], [], []>} : vector<8x12xf32>, vector<12x128xf32>, vector<8x128xf32> -> vector<8x128xf32>
    %10 = arith.addf %8, %9 : vector<8x128xf32>
    %11 = vector.broadcast %4 : vector<1x128xf32> to vector<8x128xf32>
    %12 = arith.addf %10, %11 : vector<8x128xf32>
    %cst_11 = arith.constant 0.000000e+00 : f32
    %13 = vector.broadcast %cst_11 : f32 to vector<8x128xf32>
    %14 = arith.maximumf %12, %13 : vector<8x128xf32>
    %cst_12 = arith.constant dense<0.000000e+00> : vector<8x128xf32>
    %15 = tpu.matmul %14, %5, %cst_12 {dimension_numbers = #tpu.dot_dimension_numbers<[1], [0], [0], [1], [0, 0, 1, 1], [], []>} : vector<8x128xf32>, vector<128x128xf32>, vector<8x128xf32> -> vector<8x128xf32>
    %cst_13 = arith.constant 0.000000e+00 : f32
    %16 = vector.broadcast %cst_13 : f32 to vector<8x128xf32>
    %17 = arith.maximumf %15, %16 : vector<8x128xf32>
    %cst_14 = arith.constant dense<0.000000e+00> : vector<8x128xf32>
    %18 = tpu.matmul %17, %6, %cst_14 {dimension_numbers = #tpu.dot_dimension_numbers<[1], [0], [0], [1], [0, 0, 1, 1], [], []>} : vector<8x128xf32>, vector<128x128xf32>, vector<8x128xf32> -> vector<8x128xf32>
    %cst_15 = arith.constant 0.000000e+00 : f32
    %19 = vector.broadcast %cst_15 : f32 to vector<8x128xf32>
    %20 = arith.maximumf %18, %19 : vector<8x128xf32>
    %cst_16 = arith.constant dense<0.000000e+00> : vector<8x128xf32>
    %21 = tpu.matmul %20, %7, %cst_16 {dimension_numbers = #tpu.dot_dimension_numbers<[1], [0], [0], [1], [0, 0, 1, 1], [], []>} : vector<8x128xf32>, vector<128x128xf32>, vector<8x128xf32> -> vector<8x128xf32>
    %cst_17 = arith.constant 0.000000e+00 : f32
    %22 = vector.broadcast %cst_17 : f32 to vector<8x128xf32>
    %23 = arith.maximumf %21, %22 : vector<8x128xf32>
    %c0_18 = arith.constant 0 : index
    %c0_19 = arith.constant 0 : index
    %24 = vector.load %arg4[%c0_18, %c0_19] : memref<8x128xf32, #tpu.memory_space<vmem>>, vector<8x128xf32>
    tpu.vector_store %arg4[%c0_18, %c0_19], %23 {strides = array<i32>} : memref<8x128xf32, #tpu.memory_space<vmem>>, vector<8x128xf32>,
    return
  }
  func.func @transform_0(%arg0: i32) -> (i32, i32) {
    %c0_i32 = arith.constant 0 : i32
    %c0_i32_0 = arith.constant 0 : i32
    return %arg0, %c0_i32 : i32, i32
  }
  func.func @transform_1(%arg0: i32) -> (i32, i32) {
    %c0_i32 = arith.constant 0 : i32
    %c0_i32_0 = arith.constant 0 : i32
    return %arg0, %c0_i32 : i32, i32
  }
  func.func @transform_2(%arg0: i32) -> (i32, i32) {
    %c0_i32 = arith.constant 0 : i32
    %c0_i32_0 = arith.constant 0 : i32
    %c0_i32_1 = arith.constant 0 : i32
    return %c0_i32, %c0_i32_0 : i32, i32
  }
  func.func @transform_3(%arg0: i32) -> (i32, i32) {
    %c0_i32 = arith.constant 0 : i32
    %c0_i32_0 = arith.constant 0 : i32
    return %arg0, %c0_i32 : i32, i32
  }
}

</mosaic_0001>

<bundles_post_ra>
// kernel: forward.1
= control target key start
LH: loop header
LB: loop body
LE: loop exit
PB: predicated region body
PF: predicated region fallthrough
CT: control target
= control target key end

     0   :  { %8 = vsyncpa [#allocation3], 0  ;;  %s931_s0 = inlined_call_operand.hbm [shape: f32[8,24], index: 0, kind: input, shape index: {}]   ;;  %s932_s1 = inlined_call_operand.hbm [shape: f32[8,12], index: 1, kind: input, shape index: {}]   ;;  %s933_s2 = inlined_call_operand.hbm [shape: f32[448,128], index: 2, kind: input, shape index: {}]   ;;  %s934_s3 = inlined_call_operand.vmem [shape: f32[8,128], index: 3, kind: output, shape index: {}]  }
   0x1   :  { %9 = vsyncpa [#allocation5], 0  ;;  %s826_s12 = smov [#allocation4]   ;;  %s827_s14 = smov [#allocation2]  }
   0x2   :  { %s26_s13 = sshll.u32 %s826_s12, 4  ;;  %s16_s15 = sshll.u32 %s827_s14, 4  ;;  %s27_s13 = int_to_ptr.vmem [resolvable:$true] %s26_s13  ;;  %s17_s15 = int_to_ptr.vmem [resolvable:$true] %s16_s15 }
   0x3   :  { %s756_s18 = scalar_lea.hbm %s932_s1, 128 }
   0x4   :  { %p757_p0 = scmp.ne.s32.totalorder %s932_s1, %s756_s18  ;;  %p760_p1 = scmp.lt.u32.totalorder %s756_s18, %s932_s1 }
   0x6   :  { %p762_p2 = pnand %p760_p1, %p757_p0 }
   0x8   :  { %765 = shalt.err (!%p762_p2)
}
   0x9   :  { %s766_s23 = scalar_lea.vmem %s27_s13, 128  ;;  %p771_p4 = scmp.lt.s32.totalorder %s27_s13, %s27_s13 }
   0xa   :  { %p767_p3 = scmp.ne.s32.totalorder %s27_s13, %s766_s23  ;;  %p772_p5 = scmp.lt.s32.totalorder %s766_s23, %s766_s23 }
   0xc   :  { %p773_p6 = por %p772_p5, %p771_p4 }
   0xe   :  { %p774_p7 = pnand %p773_p6, %p767_p3 }
  0x10   :  { %777 = shalt.err (!%p774_p7)
}
  0x11   :  { %29 = dma.hbm_to_vmem [thread:$0]  %s932_s1, 128, %s27_s13, [#allocation5]  }
  0x12   :  { %s778_s28 = scalar_lea.hbm %s931_s0, 128 }
  0x13   :  { %p779_p8 = scmp.ne.s32.totalorder %s931_s0, %s778_s28  ;;  %p782_p9 = scmp.lt.u32.totalorder %s778_s28, %s931_s0 }
  0x15   :  { %p784_p10 = pnand %p782_p9, %p779_p8 }
  0x17   :  { %787 = shalt.err (!%p784_p10)
}
  0x18   :  { %s788_s6 = scalar_lea.vmem %s17_s15, 128  ;;  %p793_p12 = scmp.lt.s32.totalorder %s17_s15, %s17_s15 }
  0x19   :  { %p789_p11 = scmp.ne.s32.totalorder %s17_s15, %s788_s6  ;;  %p794_p13 = scmp.lt.s32.totalorder %s788_s6, %s788_s6 }
  0x1b   :  { %p795_p0 = por %p794_p13, %p793_p12 }
  0x1d   :  { %p796_p1 = pnand %p795_p0, %p789_p11 }
  0x1f   :  { %799 = shalt.err (!%p796_p1)
}
  0x20   :  { %19 = dma.hbm_to_vmem [thread:$0]  %s931_s0, 128, %s17_s15, [#allocation3]  }
  0x21   :  { %s828_s8 = smov [#allocation6]   ;;  %s800_s12 = scalar_lea.hbm %s933_s2, 7168 }
  0x22   :  { %s35_s9 = sshll.u32 %s828_s8, 4  ;;  %p801_p2 = scmp.ne.s32.totalorder %s933_s2, %s800_s12  ;;  %s36_s9 = int_to_ptr.vmem [resolvable:$true] %s35_s9 }
  0x23   :  { %p804_p3 = scmp.lt.u32.totalorder %s800_s12, %s933_s2 }
  0x25   :  { %p806_p4 = pnand %p804_p3, %p801_p2 }
  0x27   :  { %809 = shalt.err (!%p806_p4)
}
  0x28   :  { %s810_s18 = scalar_lea.vmem %s36_s9, 7168  ;;  %p815_p6 = scmp.lt.s32.totalorder %s36_s9, %s36_s9 }
  0x29   :  { %p811_p5 = scmp.ne.s32.totalorder %s36_s9, %s810_s18  ;;  %p816_p7 = scmp.lt.s32.totalorder %s810_s18, %s810_s18 }
  0x2b   :  { %p817_p8 = por %p816_p7, %p815_p6 }
  0x2d   :  { %p818_p9 = pnand %p817_p8, %p811_p5 }
  0x2f   :  { %821 = shalt.err (!%p818_p9)
}
  0x30   :  { %s829_s0 = smov 128   ;;  %s830_s15 = smov 8  }
  0x31   :  { %41 = dma.hbm_to_vmem [thread:$0]  %s933_s2, 7168, %s36_s9, [#allocation5], %s829_s0, %s829_s0, %s830_s15  }
  0x32   :  { %822 = dma.done.wait [#allocation3], 128  }
  0x33   :  { %823 = vsyncadd [#allocation3], 4294967168 }
  0x34   :  { %824 = dma.done.wait [#allocation5], 7296  }
  0x35   :  { %825 = vsyncadd [#allocation5], 4294960000  ;;  %v831_v0 = vmov 0.0|0.0   ;;  %vm832_vm0 = vmmov 0   ;;  %v833_v1 = vmov 0.0   ;;  %vm111_vm1 = vcmask 1043456  }
  0x36   :  { %668 = vmatprep.subr.bf16.mxu1 %v831_v0  ;;  %675 = vmatprep.subr.bf16.mxu0 %v831_v0  ;;  %v56_v2 = vld [vmem:[#allocation6 + $0x20] sm:$0xff]  ;;  %v57_v3 = vld [vmem:[#allocation6 + $0x28] sm:$0xf]  ;;  %vm834_vm2 = vmmov 1   ;;  %v52_v9 = vld [vmem:[#allocation4] sm:$0xff]  ;;  %vm107_vm4 = vcmask 97280  }
  0x37   :  { %551 = vmatprep.mubr.msk.f32.mxu1 %vm832_vm0, %v833_v1  ;;  %595 = vmatprep.mubr.msk.f32.mxu0 %vm832_vm0, %v833_v1  ;;  %vm670_vm3 = vmpackc.low %vm111_vm1, %vm834_vm2  ;;  %v669_v4 = vpack.c.bf16 %v57_v3, %v56_v2  ;;  %v53_v5 = vld [vmem:[#allocation6] sm:$0xff]  ;;  %v54_v6 = vld [vmem:[#allocation6 + $0x8] sm:$0xff]  ;;  %vm185_vm5 = vcmask 195584  }
  0x38   :  { %v59_v7 = vld [vmem:[#allocation6 + $0x40] sm:$0xff]  ;;  %v60_v8 = vld [vmem:[#allocation6 + $0x48] sm:$0xff]  ;;  %v673_v10 = vpack.c.bf16 %v54_v6, %v53_v5  ;;  %v61_v12 = vld [vmem:[#allocation6 + $0x50] sm:$0xff] }
  0x39   :  { %671 = vmatpush3.bf16.msk.msra.mxu1 %vm670_vm3, %v669_v4  ;;  %v676_v11 = vpack.c.bf16 %v60_v8, %v59_v7  ;;  %v62_v13 = vld [vmem:[#allocation6 + $0x58] sm:$0xff]  ;;  %v63_v15 = vld [vmem:[#allocation6 + $0x60] sm:$0xff]  ;;  %v64_v16 = vld [vmem:[#allocation6 + $0x68] sm:$0xff] }
  0x3a   :  { %672 = vmatprep.subr.bf16.mxu1 %v831_v0  ;;  %v679_v14 = vpack.c.bf16 %v62_v13, %v61_v12  ;;  %v55_v17 = vld [vmem:[#allocation6 + $0x10] sm:$0xff]  ;;  %v682_v19 = vpack.c.bf16 %v64_v16, %v63_v15  ;;  %v66_v21 = vld [vmem:[#allocation6 + $0x78] sm:$0xff]  ;;  %v67_v23 = vld [vmem:[#allocation6 + $0x80] sm:$0xff] }
  0x3b   :  { %677 = vmatpush3.bf16.msra.mxu0 %v676_v11  ;;  %v51_v18 = vld [vmem:[#allocation2] sm:$0xff]  ;;  %v68_v24 = vld [vmem:[#allocation6 + $0x88] sm:$0xff]  ;;  %v70_v27 = vld [vmem:[#allocation6 + $0x98] sm:$0xff] }
  0x3c   :  { %552 = vmatmul.mubr.msk.f32.vlgmr.msra.gmra.mrb[0].mxu1 %vm107_vm4, %v52_v9  ;;  %678 = vmatprep.subr.bf16.mxu0 %v831_v0  ;;  %v65_v20 = vld [vmem:[#allocation6 + $0x70] sm:$0xff]  ;;  %v688_v25 = vpack.c.bf16 %v68_v24, %v67_v23  ;;  %v71_v29 = vld [vmem:[#allocation6 + $0xa0] sm:$0xff]  ;;  %v72_v30 = vld [vmem:[#allocation6 + $0xa8] sm:$0xff] }
  0x3d   :  { %674 = vmatpush3.bf16.msra.mxu1 %v673_v10  ;;  %560 = vmatprep.mubr.msk.f32.mxu1 %vm832_vm0, %v833_v1  ;;  %v685_v22 = vpack.c.bf16 %v66_v21, %v65_v20  ;;  %v69_v26 = vld [vmem:[#allocation6 + $0x90] sm:$0xff]  ;;  %v694_v31 = vpack.c.bf16 %v72_v30, %v71_v29  ;;  %v74_v33 = vld [vmem:[#allocation6 + $0xb8] sm:$0xff]  ;;  %v75_v35 = vld [vmem:[#allocation6 + $0xc0] sm:$0xff] }
  0x3e   :  { %558 = vmatprep.subr.mxu1 %v833_v1  ;;  %v691_v28 = vpack.c.bf16 %v70_v27, %v69_v26  ;;  %v73_v32 = vld [vmem:[#allocation6 + $0xb0] sm:$0xff]  ;;  %v76_v36 = vld [vmem:[#allocation6 + $0xc8] sm:$0xff]  ;;  %v78_v39 = vld [vmem:[#allocation6 + $0xd8] sm:$0xff] }
  0x3f   :  { %680 = vmatpush3.bf16.msra.mxu0 %v679_v14  ;;  %v697_v34 = vpack.c.bf16 %v74_v33, %v73_v32  ;;  %v77_v37 = vld [vmem:[#allocation6 + $0xd0] sm:$0xff]  ;;  %v700_v38 = vpack.c.bf16 %v76_v36, %v75_v35  ;;  %v79_v41 = vld [vmem:[#allocation6 + $0xe0] sm:$0xff]  ;;  %v80_v42 = vld [vmem:[#allocation6 + $0xe8] sm:$0xff] }
  0x40   :  { %681 = vmatprep.subr.bf16.mxu0 %v831_v0  ;;  %v703_v40 = vpack.c.bf16 %v78_v39, %v77_v37  ;;  %v706_v43 = vpack.c.bf16 %v80_v42, %v79_v41  ;;  %v81_v44 = vld [vmem:[#allocation6 + $0xf0] sm:$0xff]  ;;  %v82_v45 = vld [vmem:[#allocation6 + $0xf8] sm:$0xff]  ;;  %v83_v47 = vld [vmem:[#allocation6 + $0x100] sm:$0xff] }
  0x41   :  { %559 = vmatpush3.msra.mxu1 %v55_v17  ;;  %v709_v46 = vpack.c.bf16 %v82_v45, %v81_v44  ;;  %v84_v48 = vld [vmem:[#allocation6 + $0x108] sm:$0xff]  ;;  %v85_v50 = vld [vmem:[#allocation6 + $0x110] sm:$0xff]  ;;  %v86_v51 = vld [vmem:[#allocation6 + $0x118] sm:$0xff] }
  0x42   :  { %561 = vmatmul.mubr.msk.f32.vlgmr.msra.gmra.mrb[2].mxu1 %vm185_vm5, %v51_v18  ;;  %699 = vmatprep.subr.bf16.mxu1 %v831_v0  ;;  %v712_v49 = vpack.c.bf16 %v84_v48, %v83_v47  ;;  %v715_v52 = vpack.c.bf16 %v86_v51, %v85_v50  ;;  %v87_v53 = vld [vmem:[#allocation6 + $0x120] sm:$0xff]  ;;  %v88_v54 = vld [vmem:[#allocation6 + $0x128] sm:$0xff]  ;;  %v488_v58 = vld [vmem:[#allocation6 + $0x30] ss:$0 sm:$0xff] }
  0x43   :  { %683 = vmatpush3.bf16.msra.mxu0 %v682_v19  ;;  %630 = vmatprep.mubr.msk.f32.mxu1 %vm832_vm0, %v833_v1  ;;  %v718_v55 = vpack.c.bf16 %v88_v54, %v87_v53  ;;  %v89_v2 = vld [vmem:[#allocation6 + $0x130] sm:$0xff]  ;;  %v90_v3 = vld [vmem:[#allocation6 + $0x138] sm:$0xff]  ;;  %v91_v5 = vld [vmem:[#allocation6 + $0x140] sm:$0xff] }
  0x44   :  { %684 = vmatprep.subr.bf16.mxu0 %v831_v0  ;;  %701 = vmatpush3.bf16.msra.mxu1 %v700_v38  ;;  %v721_v4 = vpack.c.bf16 %v90_v3, %v89_v2  ;;  %v92_v6 = vld [vmem:[#allocation6 + $0x148] sm:$0xff]  ;;  %v93_v7 = vld [vmem:[#allocation6 + $0x150] sm:$0xff]  ;;  %v94_v9 = vld [vmem:[#allocation6 + $0x158] sm:$0xff] }
  0x45   :  { %702 = vmatprep.subr.bf16.mxu1 %v831_v0  ;;  %v724_v8 = vpack.c.bf16 %v92_v6, %v91_v5  ;;  %v727_v10 = vpack.c.bf16 %v94_v9, %v93_v7  ;;  %v95_v11 = vld [vmem:[#allocation6 + $0x160] sm:$0xff]  ;;  %v96_v12 = vld [vmem:[#allocation6 + $0x168] sm:$0xff]  ;;  %v98_v14 = vld [vmem:[#allocation6 + $0x178] sm:$0xff] }
  0x46   :  { %v730_v13 = vpack.c.bf16 %v96_v12, %v95_v11  ;;  %v99_v16 = vld [vmem:[#allocation6 + $0x180] sm:$0xff]  ;;  %v100_v17 = vld [vmem:[#allocation6 + $0x188] sm:$0xff]  ;;  %v101_v19 = vld [vmem:[#allocation6 + $0x190] sm:$0xff] }
  0x47   :  { %686 = vmatpush3.bf16.msra.mxu0 %v685_v22  ;;  %v736_v18 = vpack.c.bf16 %v100_v17, %v99_v16  ;;  %v102_v20 = vld [vmem:[#allocation6 + $0x198] sm:$0xff]  ;;  %v103_v22 = vld [vmem:[#allocation6 + $0x1a0] sm:$0xff]  ;;  %v104_v23 = vld [vmem:[#allocation6 + $0x1a8] sm:$0xff] }
  0x48   :  { %687 = vmatprep.subr.bf16.mxu0 %v831_v0  ;;  %704 = vmatpush3.bf16.msra.mxu1 %v703_v40  ;;  %v739_v21 = vpack.c.bf16 %v102_v20, %v101_v19  ;;  %v742_v24 = vpack.c.bf16 %v104_v23, %v103_v22  ;;  %v106_v29 = vld [vmem:[#allocation6 + $0x1b8] sm:$0xff] }
  0x49   :  { %705 = vmatprep.subr.bf16.mxu1 %v831_v0 }
  0x4b   :  { %689 = vmatpush3.bf16.msra.mxu0 %v688_v25 }
  0x4c   :  { %690 = vmatprep.subr.bf16.mxu0 %v831_v0  ;;  %707 = vmatpush3.bf16.msra.mxu1 %v706_v43 }
  0x4d   :  { %708 = vmatprep.subr.bf16.mxu1 %v831_v0 }
  0x4f   :  { %692 = vmatpush3.bf16.msra.mxu0 %v691_v28  ;;  %v105_v28 = vld [vmem:[#allocation6 + $0x1b0] sm:$0xff] }
  0x50   :  { %693 = vmatprep.subr.bf16.mxu0 %v831_v0  ;;  %710 = vmatpush3.bf16.msra.mxu1 %v709_v46  ;;  %v745_v30 = vpack.c.bf16 %v106_v29, %v105_v28 }
  0x51   :  { %711 = vmatprep.subr.bf16.mxu1 %v831_v0 }
  0x53   :  { %695 = vmatpush3.bf16.msra.mxu0 %v694_v31 }
  0x54   :  { %696 = vmatprep.subr.bf16.mxu0 %v831_v0  ;;  %713 = vmatpush3.bf16.msra.mxu1 %v712_v49 }
  0x55   :  { %714 = vmatprep.subr.bf16.mxu1 %v831_v0 }
  0x57   :  { %698 = vmatpush3.bf16.msra.mxu0 %v697_v34 }
  0x58   :  { %723 = vmatprep.subr.bf16.mxu0 %v831_v0  ;;  %716 = vmatpush3.bf16.msra.mxu1 %v715_v52 }
  0x59   :  { %717 = vmatprep.subr.bf16.mxu1 %v831_v0 }
  0x5c   :  { %719 = vmatpush3.bf16.msra.mxu1 %v718_v55 }
  0x5d   :  { %720 = vmatprep.subr.bf16.mxu1 %v831_v0 }
  0x60   :  { %722 = vmatpush3.bf16.msra.mxu1 %v721_v4 }
 0x10f   :  { %v181_v56 = vpop.f32.mrb[0].mxu1 }
 0x110   :  { %v553_v57 = vpop.f32.mrb[1].mxu1 }
 0x115   :  { %v255_v59 = vpop.f32.mrb[2].mxu1 }
 0x116   :  { %v256_v60 = vadd.f32 %v255_v59, %v181_v56  ;;  %v562_v61 = vpop.f32.mrb[3].mxu1 }
 0x118   :  { %v263_v62 = vadd.f32 %v488_v58, %v256_v60 }
 0x11a   :  { %v264_v63 = vmax.f32 %v263_v62, 0.0 }
 0x11c   :  { %596 = vmatmul.mubr.f32.vlgmr.msra.gmra.mrb[0].mxu0 %v264_v63 }
 0x11d   :  { %665 = vmatprep.mubr.msk.f32.mxu0 %vm832_vm0, %v833_v1  ;;  %725 = vmatpush3.bf16.msra.mxu0 %v724_v8  ;;  %v97_v1 = vld [vmem:[#allocation6 + $0x170] sm:$0xff] }
 0x11e   :  { %726 = vmatprep.subr.bf16.mxu0 %v831_v0  ;;  %v733_v15 = vpack.c.bf16 %v98_v14, %v97_v1 }
 0x121   :  { %728 = vmatpush3.bf16.msra.mxu0 %v727_v10 }
 0x122   :  { %729 = vmatprep.subr.bf16.mxu0 %v831_v0 }
 0x125   :  { %731 = vmatpush3.bf16.msra.mxu0 %v730_v13 }
 0x126   :  { %732 = vmatprep.subr.bf16.mxu0 %v831_v0 }
 0x129   :  { %734 = vmatpush3.bf16.msra.mxu0 %v733_v15 }
 0x12a   :  { %735 = vmatprep.subr.bf16.mxu0 %v831_v0 }
 0x12d   :  { %737 = vmatpush3.bf16.msra.mxu0 %v736_v18 }
 0x12e   :  { %738 = vmatprep.subr.bf16.mxu0 %v831_v0 }
 0x131   :  { %740 = vmatpush3.bf16.msra.mxu0 %v739_v21 }
 0x132   :  { %741 = vmatprep.subr.bf16.mxu0 %v831_v0 }
 0x135   :  { %743 = vmatpush3.bf16.msra.mxu0 %v742_v24 }
 0x136   :  { %744 = vmatprep.subr.bf16.mxu0 %v831_v0 }
 0x139   :  { %746 = vmatpush3.bf16.msra.mxu0 %v745_v30 }
 0x1ef   :  { %v331_v25 = vpop.f32.mrb[0].mxu0 }
 0x1f0   :  { %v335_v26 = vmax.f32 %v331_v25, 0.0  ;;  %v597_v27 = vpop.f32.mrb[1].mxu0 }
 0x1f2   :  { %631 = vmatmul.mubr.f32.vlgmr.msra.gmra.mrb[4].mxu1 %v335_v26 }
 0x2c5   :  { %v402_v31 = vpop.f32.mrb[4].mxu1 }
 0x2c6   :  { %v406_v32 = vmax.f32 %v402_v31, 0.0  ;;  %v632_v33 = vpop.f32.mrb[5].mxu1 }
 0x2c8   :  { %666 = vmatmul.mubr.f32.vlgmr.msra.gmra.mrb[2].mxu0 %v406_v32 }
 0x39b   :  { %v473_v34 = vpop.f32.mrb[2].mxu0 }
 0x39c   :  { %v477_v35 = vmax.f32 %v473_v34, 0.0  ;;  %v667_v36 = vpop.f32.mrb[3].mxu0 }
 0x39e   :  { %478 = vst [vmem:[%s934_s3] sm:$0xff] %v477_v35 }
 0x39f   :  { %483 = vsyncpa [#allocation3], 1 }
 0x3a0   :  { %484 = vsyncpa [#allocation5], 1 }

</bundles_post_ra>
